<compile_context>
chip_gen: v7x
topology: tpu7x:2x2x1
jax: 0.10.0
libtpu: 0.0.40
codegen_flags: <defaults>
</compile_context>

<pallas_src>
import math

import jax
import jax.numpy as jnp
from jax.experimental import pallas as pl
from jax.experimental.pallas import tpu as pltpu


def _round_up(x, m):
    return (x + m - 1) // m * m


def _cdiv(a, b):
    return (a + b - 1) // b


def _vmem_budget_bytes():
    """VMEM budget with headroom: 75% of physical VMEM, capped at 100 MiB."""
    cap = 64 * 1024 * 1024  # conservative fallback (v7x per-TensorCore VMEM)
    try:
        info = pltpu.get_tpu_info()
        cap = int(getattr(info, "vmem_capacity_bytes", cap))
    except Exception:
        pass
    return min(cap * 3 // 4, 100 * 1024 * 1024)


# ----------------------------------------------------------------------------
# Kernels
# ----------------------------------------------------------------------------

def _ffn_kernel_resident(x_ref, w1_ref, b1_ref, w2_ref, b2_ref, o_ref):
    # Whole W1/W2 are VMEM-resident (constant block index across the row grid).
    x = x_ref[...].astype(w1_ref.dtype)                     # in-kernel cast (bf16 path)
    h = jnp.dot(x, w1_ref[...], preferred_element_type=jnp.float32)
    h = jnp.maximum(h + b1_ref[...], 0.0)                   # bias + ReLU in f32 (VPU)
    # TODO(synk): eval-mode dropout is the identity; training-mode dropout would
    # draw a keep mask here via pltpu.prng_seed / pltpu.prng_random_bits.
    h = h.astype(w2_ref.dtype)                               # keep MXU at bf16 rate
    y = jnp.dot(h, w2_ref[...], preferred_element_type=jnp.float32)
    o_ref[...] = (y + b2_ref[...]).astype(o_ref.dtype)


def _ffn_kernel_streamed(x_ref, w1_ref, b1_ref, w2_ref, b2_ref, o_ref, acc_ref):
    # Hidden dim streamed in tk chunks on grid axis 1; f32 accumulator resident.
    k = pl.program_id(1)

    @pl.when(k == 0)
    def _init():
        acc_ref[...] = jnp.zeros_like(acc_ref)

    x = x_ref[...].astype(w1_ref.dtype)
    h = jnp.dot(x, w1_ref[...], preferred_element_type=jnp.float32)
    h = jnp.maximum(h + b1_ref[...], 0.0)
    h = h.astype(w2_ref.dtype)
    acc_ref[...] += jnp.dot(h, w2_ref[...], preferred_element_type=jnp.float32)

    @pl.when(k == pl.num_programs(1) - 1)
    def _finalize():
        o_ref[...] = (acc_ref[...] + b2_ref[...]).astype(o_ref.dtype)


# ----------------------------------------------------------------------------
# One-time parameter preparation (do at model init, not per forward call)
# ----------------------------------------------------------------------------

def prepare_ffn_params(w1, b1, w2, b2, *, compute_dtype=jnp.bfloat16):
    """w1: (d_model, hidden), b1: (hidden,), w2: (hidden, d_model), b2: (d_model,)
    (already transposed relative to PyTorch's (out, in) Linear layout).

    Pads hidden to a multiple of 128 and casts weights to compute_dtype; the
    biases stay f32 (bias + ReLU are evaluated in f32)."""
    d_model, hidden = w1.shape
    h_pad = _round_up(hidden, 128)
    w1p = jnp.pad(w1, ((0, 0), (0, h_pad - hidden))).astype(compute_dtype)
    b1p = jnp.pad(b1, ((0, h_pad - hidden),)).reshape(1, h_pad).astype(jnp.float32)
    w2p = jnp.pad(w2, ((0, h_pad - hidden), (0, 0))).astype(compute_dtype)
    b2p = b2.reshape(1, d_model).astype(jnp.float32)
    return dict(w1=w1p, b1=b1p, w2=w2p, b2=b2p, d_model=d_model, hidden=hidden)


# ----------------------------------------------------------------------------
# Tile / variant selection
# ----------------------------------------------------------------------------

def _pick_tk(h_pad, target):
    """Largest multiple of 128 that divides h_pad and is <= target."""
    n_blk = h_pad // 128
    best = 1
    for d in range(1, n_blk + 1):
        if n_blk % d == 0 and d * 128 <= target:
            best = d
    return best * 128


def _choose_config(M, d_model, h_pad, x_bytes, w_bytes, o_bytes, budget,
                   tm=None, tk=None, weights_resident=None):
    bias_vmem = 4 * (h_pad + d_model) * 2

    def resident_vmem(tm_):
        return (2 * 2 * d_model * h_pad * w_bytes            # W1 + W2 (2 buffers each)
                + 2 * tm_ * d_model * (x_bytes + o_bytes)     # x / out tiles (2 buffers)
                + tm_ * h_pad * 4 + tm_ * d_model * 4         # f32 intermediates
                + bias_vmem)

    def streamed_vmem(tm_, tk_):
        return (2 * 2 * d_model * tk_ * w_bytes               # W1/W2 chunks (2 buffers)
                + 2 * tm_ * d_model * (x_bytes + o_bytes)
                + tm_ * d_model * 4                            # f32 acc scratch
                + tm_ * tk_ * 4                                # f32 h chunk
                + bias_vmem)

    tm_cap = _round_up(M, 8)
    if tm is not None:
        cands = [min(_round_up(tm, 8), tm_cap)]
    else:
        cands = [t for t in (512, 256, 128, 64, 32, 16, 8) if t <= tm_cap] or [tm_cap]
    # Prefer >=2 row tiles so the "parallel" row axis can feed both v7x TensorCores.
    cands = ([t for t in cands if _cdiv(M, t) >= 2]
             + [t for t in cands if _cdiv(M, t) < 2])

    if weights_resident is not False:
        for tm_ in cands:
            if resident_vmem(tm_) <= budget:
                return True, tm_, h_pad
        if weights_resident:  # user forced it
            return True, cands[-1], h_pad

    tk_targets = [tk] if tk is not None else [1024, 512, 256, 128]
    for tm_ in cands:
        for tgt in tk_targets:
            tk_ = _pick_tk(h_pad, tgt)
            if streamed_vmem(tm_, tk_) <= budget:
                return False, tm_, tk_
    return False, cands[-1], 128


# ----------------------------------------------------------------------------
# Forward
# ----------------------------------------------------------------------------

def position_wise_ffn(x, params, *, tm=None, tk=None, weights_resident=None):
    """x: (..., d_model) -> (..., d_model). `params` from prepare_ffn_params."""
    w1p, b1p, w2p, b2p = params["w1"], params["b1"], params["w2"], params["b2"]
    d_model = params["d_model"]
    h_pad = w1p.shape[1]
    assert x.shape[-1] == d_model

    orig_shape = x.shape
    M = math.prod(orig_shape[:-1])
    x2d = x.reshape(M, d_model)                 # metadata-only, no HBM pass

    budget = _vmem_budget_bytes()
    resident, tm_eff, tk_eff = _choose_config(
        M, d_model, h_pad,
        x_bytes=x.dtype.itemsize, w_bytes=w1p.dtype.itemsize,
        o_bytes=x.dtype.itemsize, budget=budget,
        tm=tm, tk=tk, weights_resident=weights_resident)

    n_i = _cdiv(M, tm_eff)                      # ragged last row tile handled by Pallas
    w_hbm_bytes = w1p.size * w1p.dtype.itemsize + w2p.size * w2p.dtype.itemsize
    io_bytes = 2 * M * d_model * x.dtype.itemsize
    flops = 4 * n_i * tm_eff * d_model * h_pad  # two matmuls, 2*M*K*N each

    if resident:
        grid = (n_i,)
        in_specs = [
            pl.BlockSpec((tm_eff, d_model), lambda i: (i, 0)),   # x row tile
            pl.BlockSpec((d_model, h_pad), lambda i: (0, 0)),    # W1 (fetched once)
            pl.BlockSpec((1, h_pad), lambda i: (0, 0)),          # b1
            pl.BlockSpec((h_pad, d_model), lambda i: (0, 0)),    # W2 (fetched once)
            pl.BlockSpec((1, d_model), lambda i: (0, 0)),        # b2
        ]
        out_specs = pl.BlockSpec((tm_eff, d_model), lambda i: (i, 0))
        scratch_shapes = []
        kernel = _ffn_kernel_resident
        dim_sem = ("parallel",)
        bytes_accessed = io_bytes + w_hbm_bytes               # weights read once
    else:
        n_k = h_pad // tk_eff
        grid = (n_i, n_k)
        in_specs = [
            pl.BlockSpec((tm_eff, d_model), lambda i, k: (i, 0)),  # constant over k
            pl.BlockSpec((d_model, tk_eff), lambda i, k: (0, k)),  # W1 chunk
            pl.BlockSpec((1, tk_eff), lambda i, k: (0, k)),        # b1 chunk
            pl.BlockSpec((tk_eff, d_model), lambda i, k: (k, 0)),  # W2 chunk
            pl.BlockSpec((1, d_model), lambda i, k: (0, 0)),       # b2
        ]
        out_specs = pl.BlockSpec((tm_eff, d_model), lambda i, k: (i, 0))
        scratch_shapes = [pltpu.VMEM((tm_eff, d_model), jnp.float32)]
        kernel = _ffn_kernel_streamed
        dim_sem = ("parallel", "arbitrary")
        bytes_accessed = io_bytes + n_i * w_hbm_bytes          # weights re-streamed per row tile

    out = pl.pallas_call(
        kernel,
        out_shape=jax.ShapeDtypeStruct((M, d_model), x.dtype),
        grid_spec=pltpu.PrefetchScalarGridSpec(
            num_scalar_prefetch=0,
            grid=grid,
            in_specs=in_specs,
            out_specs=out_specs,
            scratch_shapes=scratch_shapes,
        ),
        compiler_params=pltpu.CompilerParams(
            dimension_semantics=dim_sem,
            vmem_limit_bytes=budget,
        ),
        cost_estimate=pl.CostEstimate(
            flops=int(flops), transcendentals=0, bytes_accessed=int(bytes_accessed)),
    )(x2d, w1p, b1p, w2p, b2p)

    return out.reshape(orig_shape)


# ----------------------------------------------------------------------------
# Self-test
# ----------------------------------------------------------------------------

if __name__ == "__main__":
    # Small shapes consistent with the module: batch=2, seq=8, d_model=16, hidden=32.
    B, S, d_model, hidden = 2, 8, 16, 32

    key = jax.random.PRNGKey(0)
    kx, kw1, kb1, kw2, kb2 = jax.random.split(key, 5)

    x = jax.random.normal(kx, (B, S, d_model), dtype=jnp.float32)

    # PyTorch nn.Linear-style uniform init, stored pre-transposed ((in, out)).
    bound1 = 1.0 / (d_model ** 0.5)
    bound2 = 1.0 / (hidden ** 0.5)
    w1 = jax.random.uniform(kw1, (d_model, hidden), jnp.float32, -bound1, bound1)
    b1 = jax.random.uniform(kb1, (hidden,), jnp.float32, -bound1, bound1)
    w2 = jax.random.uniform(kw2, (hidden, d_model), jnp.float32, -bound2, bound2)
    b2 = jax.random.uniform(kb2, (d_model,), jnp.float32, -bound2, bound2)

    # Pure-JAX reference (eval-mode dropout == identity).
    ref = jnp.maximum(x @ w1 + b1, 0.0) @ w2 + b2

    # f32 compute path (weights-resident kernel): tight check.
    params_f32 = prepare_ffn_params(w1, b1, w2, b2, compute_dtype=jnp.float32)
    y_f32 = jax.block_until_ready(position_wise_ffn(x, params_f32))
    assert y_f32.shape == (B, S, d_model)
    assert jnp.allclose(y_f32, ref, atol=1e-5, rtol=1e-5)

    # Default bf16 compute path (f32 accumulation): loose check.
    params_bf16 = prepare_ffn_params(w1, b1, w2, b2)
    y_bf16 = jax.block_until_ready(position_wise_ffn(x, params_bf16))
    assert jnp.allclose(y_bf16, ref, atol=1e-1, rtol=1e-1)

    # Second config: exercises the hidden-streaming kernel (multiple k chunks,
    # f32 accumulator) plus a ragged last row tile (M = 200 not divisible by tm).
    B2, S2, d2, h2 = 2, 100, 128, 512
    kx2, kw3, kb3, kw4, kb4 = jax.random.split(jax.random.PRNGKey(1), 5)
    x2 = jax.random.normal(kx2, (B2, S2, d2), dtype=jnp.float32)
    w3 = jax.random.uniform(kw3, (d2, h2), jnp.float32, -1.0, 1.0) / (d2 ** 0.5)
    b3 = jax.random.uniform(kb3, (h2,), jnp.float32, -1.0, 1.0) / (d2 ** 0.5)
    w4 = jax.random.uniform(kw4, (h2, d2), jnp.float32, -1.0, 1.0) / (h2 ** 0.5)
    b4 = jax.random.uniform(kb4, (d2,), jnp.float32, -1.0, 1.0) / (h2 ** 0.5)
    ref2 = jnp.maximum(x2 @ w3 + b3, 0.0) @ w4 + b4
    params2 = prepare_ffn_params(w3, b3, w4, b4, compute_dtype=jnp.float32)
    y2 = jax.block_until_ready(
        position_wise_ffn(x2, params2, tk=128, weights_resident=False))
    # Loose-ish tolerance: the XLA reference's f32 matmul precision is backend-default.
    assert jnp.allclose(y2, ref2, atol=2e-2, rtol=2e-2)

    print("KERNEL_OK")
</pallas_src>

<mosaic_0001>
module attributes {stable_mosaic.version = 11 : i64} {
  func.func @_ffn_kernel_resident(%arg0: i32, %arg1: memref<8x16xf32, #tpu.memory_space<vmem>>, %arg2: memref<16x128xf32, #tpu.memory_space<vmem>>, %arg3: memref<1x128xf32, #tpu.memory_space<vmem>>, %arg4: memref<128x16xf32, #tpu.memory_space<vmem>>, %arg5: memref<1x16xf32, #tpu.memory_space<vmem>>, %arg6: memref<8x16xf32, #tpu.memory_space<vmem>>) attributes {dimension_semantics = [#tpu.dimension_semantics<parallel>], iteration_bounds = array<i64: 2>, scalar_prefetch = 0 : i64, scratch_operands = 0 : i64, tpu.core_type = #tpu.core_type<tc>, window_params = [{transform_indices = @transform_0, window_bounds = array<i64: 8, 16>}, {pipeline_mode = #tpu.pipeline_mode<synchronous>, transform_indices = @transform_1, window_bounds = array<i64: 16, 128>}, {pipeline_mode = #tpu.pipeline_mode<synchronous>, transform_indices = @transform_2, window_bounds = array<i64: 1, 128>}, {pipeline_mode = #tpu.pipeline_mode<synchronous>, transform_indices = @transform_3, window_bounds = array<i64: 128, 16>}, {pipeline_mode = #tpu.pipeline_mode<synchronous>, transform_indices = @transform_4, window_bounds = array<i64: 1, 16>}, {transform_indices = @transform_5, window_bounds = array<i64: 8, 16>}]} {
    %c0 = arith.constant 0 : index
    %c0_0 = arith.constant 0 : index
    %0 = vector.load %arg1[%c0, %c0_0] : memref<8x16xf32, #tpu.memory_space<vmem>>, vector<8x16xf32>
    %c0_1 = arith.constant 0 : index
    %c0_2 = arith.constant 0 : index
    %1 = vector.load %arg2[%c0_1, %c0_2] : memref<16x128xf32, #tpu.memory_space<vmem>>, vector<16x128xf32>
    %cst = arith.constant dense<0.000000e+00> : vector<8x128xf32>
    %2 = tpu.matmul %0, %1, %cst {dimension_numbers = #tpu.dot_dimension_numbers<[1], [0], [0], [1], [0, 0, 1, 1], [], []>} : vector<8x16xf32>, vector<16x128xf32>, vector<8x128xf32> -> vector<8x128xf32>
    %c0_3 = arith.constant 0 : index
    %c0_4 = arith.constant 0 : index
    %3 = vector.load %arg3[%c0_3, %c0_4] : memref<1x128xf32, #tpu.memory_space<vmem>>, vector<1x128xf32>
    %4 = vector.broadcast %3 : vector<1x128xf32> to vector<8x128xf32>
    %5 = arith.addf %2, %4 : vector<8x128xf32>
    %cst_5 = arith.constant 0.000000e+00 : f32
    %6 = vector.broadcast %cst_5 : f32 to vector<8x128xf32>
    %7 = arith.maximumf %5, %6 : vector<8x128xf32>
    %c0_6 = arith.constant 0 : index
    %c0_7 = arith.constant 0 : index
    %8 = vector.load %arg4[%c0_6, %c0_7] : memref<128x16xf32, #tpu.memory_space<vmem>>, vector<128x16xf32>
    %cst_8 = arith.constant dense<0.000000e+00> : vector<8x16xf32>
    %9 = tpu.matmul %7, %8, %cst_8 {dimension_numbers = #tpu.dot_dimension_numbers<[1], [0], [0], [1], [0, 0, 1, 1], [], []>} : vector<8x128xf32>, vector<128x16xf32>, vector<8x16xf32> -> vector<8x16xf32>
    %c0_9 = arith.constant 0 : index
    %c0_10 = arith.constant 0 : index
    %10 = vector.load %arg5[%c0_9, %c0_10] : memref<1x16xf32, #tpu.memory_space<vmem>>, vector<1x16xf32>
    %11 = vector.broadcast %10 : vector<1x16xf32> to vector<8x16xf32>
    %12 = arith.addf %9, %11 : vector<8x16xf32>
    %c0_11 = arith.constant 0 : index
    %c0_12 = arith.constant 0 : index
    %13 = vector.load %arg6[%c0_11, %c0_12] : memref<8x16xf32, #tpu.memory_space<vmem>>, vector<8x16xf32>
    tpu.vector_store %arg6[%c0_11, %c0_12], %12 {strides = array<i32>} : memref<8x16xf32, #tpu.memory_space<vmem>>, vector<8x16xf32>,
    return
  }
  func.func @transform_0(%arg0: i32) -> (i32, i32) {
    %c0_i32 = arith.constant 0 : i32
    %c0_i32_0 = arith.constant 0 : i32
    return %arg0, %c0_i32 : i32, i32
  }
  func.func @transform_1(%arg0: i32) -> (i32, i32) {
    %c0_i32 = arith.constant 0 : i32
    %c0_i32_0 = arith.constant 0 : i32
    %c0_i32_1 = arith.constant 0 : i32
    return %c0_i32, %c0_i32_0 : i32, i32
  }
  func.func @transform_2(%arg0: i32) -> (i32, i32) {
    %c0_i32 = arith.constant 0 : i32
    %c0_i32_0 = arith.constant 0 : i32
    %c0_i32_1 = arith.constant 0 : i32
    return %c0_i32, %c0_i32_0 : i32, i32
  }
  func.func @transform_3(%arg0: i32) -> (i32, i32) {
    %c0_i32 = arith.constant 0 : i32
    %c0_i32_0 = arith.constant 0 : i32
    %c0_i32_1 = arith.constant 0 : i32
    return %c0_i32, %c0_i32_0 : i32, i32
  }
  func.func @transform_4(%arg0: i32) -> (i32, i32) {
    %c0_i32 = arith.constant 0 : i32
    %c0_i32_0 = arith.constant 0 : i32
    %c0_i32_1 = arith.constant 0 : i32
    return %c0_i32, %c0_i32_0 : i32, i32
  }
  func.func @transform_5(%arg0: i32) -> (i32, i32) {
    %c0_i32 = arith.constant 0 : i32
    %c0_i32_0 = arith.constant 0 : i32
    return %arg0, %c0_i32 : i32, i32
  }
}

</mosaic_0001>

<bundles_post_ra>
// kernel: tpu_custom_call.1
= control target key start
LH: loop header
LB: loop body
LE: loop exit
PB: predicated region body
PF: predicated region fallthrough
CT: control target
= control target key end

     0   :  { %10 = vsyncpa [#allocation3], 0  ;;  %s876_s0 = inlined_call_operand.vmem [shape: f32[16,16], index: 0, kind: input, shape index: {}]   ;;  %s877_s1 = inlined_call_operand.vmem [shape: f32[16,128], index: 1, kind: input, shape index: {}]   ;;  %s878_s2 = inlined_call_operand.vmem [shape: f32[1,128], index: 2, kind: input, shape index: {}]   ;;  %s879_s3 = inlined_call_operand.vmem [shape: f32[128,16], index: 3, kind: input, shape index: {}]   ;;  %s880_s4 = inlined_call_operand.vmem [shape: f32[1,16], index: 4, kind: input, shape index: {}]   ;;  %s881_s5 = inlined_call_operand.hbm [shape: f32[16,16], index: 5, kind: output, shape index: {}]  }
   0x1   :  { %12 = vsyncpa [#allocation3 + $0x1], 0  ;;  %s714_s18 = smov 0   ;;  %s716_s19 = smov 0  }
   0x2   :  { %s718_s20 = smov 0   ;;  %s720_s21 = smov 0  }
   0x3 LB: > { %s735_s22 = sadd.s32 4294967295, %s678_s21   ;;  %s472_s23 = sadd.s32 4294967294, %s678_s21   ;;  %s678_s21 = sphi %s720_s21, %s887_s21   ;;  %s674_s20 = sphi %s718_s20, %s886_s20   ;;  %s670_s19 = sphi %s716_s19, %s885_s19   ;;  %s666_s18 = sphi %s714_s18, %s884_s18  }
   0x4   : > { %s739_s24 = sadd.s32 1, %s678_s21   ;;  %s135_s25 = sadd.s32 1, %s674_s20 }
   0x5   : > { %s132_s26 = ssub.s32 %s678_s21, %s739_s24  ;;  %p145_p0 = scmp.ne.s32.totalorder %s674_s20, %s670_s19 }
   0x6   : > { %p133_p1 = scmp.eq.s32.totalorder %s132_s26, 0  ;;  %p146_p2 = scmp.eq.s32.totalorder %s735_s22, 1 }
   0x7   : > { %p151_p3 = scmp.ne.s32.totalorder %s670_s19, %s666_s18  ;;  %p152_p4 = scmp.eq.s32.totalorder %s472_s23, 1 }
   0x8   : > { %s750_s27 = scalar_select %p133_p1, %s674_s20, %s135_s25  }
   0x9   : > { %p752_p5 = por %p146_p2, %p145_p0  ;;  %p756_p6 = por %p152_p4, %p151_p3 }
   0xa   : > { %p475_p7 = scmp.ge.s32.totalorder %s678_s21, 1  ;;  %p189_p8 = scmp.lt.s32.totalorder %s678_s21, 3 }
   0xc   : > { %p190_p9 = pnand %p475_p7, %p189_p8 }
   0xd   : > { %v221_v0 = vld [vmem:[%s877_s1] sm:$0xff] (!%p190_p9)  ;;  %v222_v1 = vld [vmem:[%s877_s1 + $0x8] sm:$0xff] (!%p190_p9)  ;;  %p216_p10 = scmp.lt.s32.totalorder (!%p190_p9), %s735_s22, 1  ;;  %v680_v2 = vmov (!%p190_p9), 0.0|0.0   ;;  %vm681_vm0 = vmmov (!%p190_p9), 0   ;;  %v682_v4 = vmov (!%p190_p9), 0.0  }
   0xe   : > { %193 = sbr.rel (%p190_p9) target bundleno = 470 (0x1d6), region = 40  ;;  %547 = vmatprep.subr.bf16.mxu0 (!%p190_p9), %v680_v2  ;;  %v548_v3 = vpack.c.bf16 (!%p190_p9), %v222_v1, %v221_v0  ;;  %509 = vmatprep.mubr.msk.f32.mxu0 (!%p190_p9), %vm681_vm0, %v682_v4  ;;  %v305_v5 = vld [vmem:[%s879_s3] sm:$0xff] (!%p190_p9)  ;;  %v306_v6 = vld [vmem:[%s879_s3 + $0x8] sm:$0xff] (!%p190_p9)  ;;  %v307_v7 = vld [vmem:[%s879_s3 + $0x10] sm:$0xff] (!%p190_p9)  ;;  %vm230_vm1 = vcmask (!%p190_p9), 130048   ;;  %s213_s16 = sand.u32 (!%p190_p9), 1, %s670_s19  }
   0xf   : > { %550 = vmatprep.subr.bf16.mxu1 (!%p190_p9), %v680_v2  ;;  %v551_v8 = vpack.c.bf16 (!%p190_p9), %v306_v6, %v305_v5  ;;  %v308_v9 = vld [vmem:[%s879_s3 + $0x18] sm:$0xff] (!%p190_p9)  ;;  %544 = vmatprep.mubr.msk.f32.mxu1 (!%p190_p9), %vm681_vm0, %v682_v4  ;;  %v309_v11 = vld [vmem:[%s879_s3 + $0x20] sm:$0xff] (!%p190_p9)  ;;  %v310_v12 = vld [vmem:[%s879_s3 + $0x28] sm:$0xff] (!%p190_p9)  ;;  %s476_s17 = sshll.u32 (!%p190_p9), %s213_s16, 3  ;;  %s482_s26 = sshll.u32 (!%p190_p9), %s735_s22, 7 }
  0x10   : > { %549 = vmatpush3.bf16.msra.mxu0 (!%p190_p9), %v548_v3  ;;  %v554_v10 = vpack.c.bf16 (!%p190_p9), %v308_v9, %v307_v7  ;;  %v557_v14 = vpack.c.bf16 (!%p190_p9), %v310_v12, %v309_v11  ;;  %v311_v15 = vld [vmem:[%s879_s3 + $0x30] sm:$0xff] (!%p190_p9)  ;;  %v312_v16 = vld [vmem:[%s879_s3 + $0x38] sm:$0xff] (!%p190_p9)  ;;  %v313_v18 = vld [vmem:[%s879_s3 + $0x40] sm:$0xff] (!%p190_p9)  ;;  %s833_s9 = scalar_lea.hbm (!%p190_p9), %s881_s5, %s482_s26  ;;  %s400_s10 = scalar_lea.sflag (!%p190_p9), [#allocation3], %s213_s16 }
  0x11   : > { %552 = vmatpush3.bf16.msra.mxu1 (!%p190_p9), %v551_v8  ;;  %v560_v17 = vpack.c.bf16 (!%p190_p9), %v312_v16, %v311_v15  ;;  %v314_v19 = vld [vmem:[%s879_s3 + $0x48] sm:$0xff] (!%p190_p9)  ;;  %v315_v21 = vld [vmem:[%s879_s3 + $0x50] sm:$0xff] (!%p190_p9)  ;;  %v316_v22 = vld [vmem:[%s879_s3 + $0x58] sm:$0xff] (!%p190_p9) }
  0x12   : > { %553 = vmatprep.subr.bf16.mxu1 (!%p190_p9), %v680_v2  ;;  %v563_v20 = vpack.c.bf16 (!%p190_p9), %v314_v19, %v313_v18  ;;  %v566_v23 = vpack.c.bf16 (!%p190_p9), %v316_v22, %v315_v21  ;;  %v317_v24 = vld [vmem:[%s879_s3 + $0x60] sm:$0xff] (!%p190_p9)  ;;  %v318_v25 = vld [vmem:[%s879_s3 + $0x68] sm:$0xff] (!%p190_p9)  ;;  %v319_v27 = vld [vmem:[%s879_s3 + $0x70] sm:$0xff] (!%p190_p9) }
  0x13   : > { %v569_v26 = vpack.c.bf16 (!%p190_p9), %v318_v25, %v317_v24  ;;  %v320_v28 = vld [vmem:[%s879_s3 + $0x78] sm:$0xff] (!%p190_p9)  ;;  %v478_v30 = vld [vmem:[%s878_s2] ss:$0 sm:$0xff] (!%p190_p9) }
  0x14   : > { %v572_v29 = vpack.c.bf16 (!%p190_p9), %v320_v28, %v319_v27  ;;  %v480_v35 = vld [vmem:[%s880_s4] ss:$0 sm:$0xff] (!%p190_p9) }
  0x15   : > { %s217_s15 = scalar_select %p216_p10, %s735_s22, 1  ;;  %555 = vmatpush3.bf16.msra.mxu1 %v554_v10 }
  0x16   : > { %556 = vmatprep.subr.bf16.mxu1 %v680_v2  ;;  %s683_s22 = smov [#allocation2]  }
  0x17   : > { %s477_s23 = sshll.u32 %s217_s15, 3  ;;  %s620_s12 = sshll.u32 %s683_s22, 4  ;;  %s621_s12 = int_to_ptr.vmem [resolvable:$false] %s620_s12 }
  0x18   : > { %s219_s30 = scalar_lea.vmem %s876_s0, %s477_s23  ;;  %s622_s13 = scalar_lea.vmem %s621_s12, 256 }
  0x19   : > { %v220_v13 = vld [vmem:[%s219_s30] sm:$0xff]  ;;  %558 = vmatpush3.bf16.msra.mxu1 %v557_v14  ;;  %s215_s30 = scalar_lea.vmem [#allocation2], %s476_s17 }
  0x1a   : > { %510 = vmatmul.mubr.msk.f32.vlgmr.msra.gmra.mrb[0].mxu0 %vm230_vm1, %v220_v13  ;;  %559 = vmatprep.subr.bf16.mxu1 %v680_v2  ;;  %s413_s6 = sshll.u32 %s215_s30, 4  ;;  %s835_s6 = int_to_ptr.vmem [resolvable:$true] %s413_s6 }
  0x1b   : > { %s616_s11 = scalar_lea.vmem %s835_s6, 128  ;;  %p623_p0 = scmp.lt.s32.totalorder %s835_s6, %s621_s12 }
  0x1c   : > { %p617_p11 = scmp.ne.s32.totalorder %s835_s6, %s616_s11  ;;  %p624_p1 = scmp.lt.s32.totalorder %s622_s13, %s616_s11 }
  0x1d   : > { %561 = vmatpush3.bf16.msra.mxu1 %v560_v17 }
  0x1e   : > { %562 = vmatprep.subr.bf16.mxu1 %v680_v2  ;;  %p618_p12 = pnand %p617_p11, %p752_p5  ;;  %p625_p2 = por %p624_p1, %p623_p0 }
  0x20   : > { %p619_p13 = pneg %p618_p12 }
  0x21   : > { %564 = vmatpush3.bf16.msra.mxu1 %v563_v20 }
  0x22   : > { %565 = vmatprep.subr.bf16.mxu1 %v680_v2  ;;  %p626_p3 = pnand %p625_p2, %p619_p13 }
  0x25   : > { %567 = vmatpush3.bf16.msra.mxu1 %v566_v23 }
  0x26   : > { %568 = vmatprep.subr.bf16.mxu1 %v680_v2 }
  0x29   : > { %570 = vmatpush3.bf16.msra.mxu1 %v569_v26 }
  0x2a   : > { %571 = vmatprep.subr.bf16.mxu1 %v680_v2 }
  0x2d   : > { %573 = vmatpush3.bf16.msra.mxu1 %v572_v29 }
  0xed   : > { %v300_v31 = vpop.f32.mrb[0].mxu0 }
  0xee   : > { %v301_v32 = vadd.f32 %v478_v30, %v300_v31  ;;  %v511_v33 = vpop.f32.mrb[1].mxu0 }
  0xf0   : > { %v304_v34 = vmax.f32 %v301_v32, 0.0 }
  0xf2   : > { %545 = vmatmul.mubr.f32.vlgmr.msra.gmra.mrb[0].mxu1 %v304_v34 }
 0x1c5   : > { %v394_v36 = vpop.f32.mrb[0].mxu1 }
 0x1c6   : > { %v395_v37 = vadd.f32 %v480_v35, %v394_v36  ;;  %v546_v38 = vpop.f32.mrb[1].mxu1 }
 0x1c8   : > { %398 = vst.msk [vmem:[%s215_s30] sm:$0xff] %vm230_vm1, %v395_v37 }
 0x1c9   : > { %629 = shalt.err (!%p626_p3)
}
 0x1ca   : > { %s630_s14 = scalar_lea.hbm %s833_s9, 128  ;;  %s634_s17 = scalar_lea.hbm %s881_s5, 256 }
 0x1cb   : > { %p631_p4 = scmp.ne.s32.totalorder %s833_s9, %s630_s14  ;;  %p635_p9 = scmp.lt.u32.totalorder %s833_s9, %s881_s5 }
 0x1cc   : > { %p636_p10 = scmp.lt.u32.totalorder %s634_s17, %s630_s14  ;;  %p638_p12 = scmp.lt.u32.totalorder %s630_s14, %s833_s9 }
 0x1cd   : > { %p632_p7 = pnand %p631_p4, %p752_p5 }
 0x1ce   : > { %p637_p11 = por %p636_p10, %p635_p9 }
 0x1cf   : > { %p633_p8 = pneg %p632_p7 }
 0x1d0   : > { %p639_p13 = por %p638_p12, %p637_p11 }
 0x1d2   : > { %p640_p0 = pnand %p639_p13, %p633_p8 }
 0x1d4   : > { %643 = shalt.err (!%p640_p0)
}
 0x1d5   : > { %574 = dma.vmem_to_hbm [thread:$0]  (%p752_p5), %s835_s6, 128, %s833_s9, %s400_s10  }
 0x1d6 PF: > { %p580_p1 = scmp.ge.s32.totalorder %s678_s21, 2  ;;  %s425_s26 = sand.u32 1, %s666_s18  }
 0x1d7   : > { %s426_s30 = scalar_lea.sflag [#allocation3], %s425_s26 }
 0x1d8   : > { %p577_p2 = pnand %p580_p1, %p756_p6 }
 0x1da   : > { %661 = dma.done.wait (!%p577_p2), %s426_s30, 128  }
 0x1db   : > { %663 = vsyncadd (!%p577_p2), %s426_s30, 4294967168  ;;  %p15_p3 = scmp.ge.s32.totalorder %s739_s24, 4   ;;  %s884_s18 = smov %s670_s19 }
 0x1dc   : > { %s885_s19 = smov %s674_s20  ;;  %s886_s20 = smov %s750_s27 }
 0x1dd   : > { %s887_s21 = smov %s739_s24  ;;  %17 = sbr.rel (!%p15_p3) target bundleno = 3 (0x3), region = 75 }
 0x1e4   :  { %431 = vsyncpa [#allocation3], 1 }
 0x1e5   :  { %433 = vsyncpa [#allocation3 + $0x1], 1 }

</bundles_post_ra>
